<compile_context>
chip_gen: v7x
topology: tpu7x:2x2x1
jax: 0.10.0
libtpu: 0.0.40
codegen_flags: <defaults>
</compile_context>

<pallas_src>
import functools

import jax
import jax.numpy as jnp
from jax import lax
from jax.experimental import pallas as pl
from jax.experimental.pallas import tpu as pltpu


def _round_up(v, m):
    return (v + m - 1) // m * m


def _chunk_attention_kernel(x_ref, w1t_ref, w2_ref, out_ref, attw_ref, s_acc,
                            *, n_real, gemm_dtype):
    # x_ref:    (Bb, Np, D)   block of Bb batch elements (Np = N padded to 8)
    # w1t_ref:  (D, Td)       tile of W1^T (in_features, out_features tile)
    # w2_ref:   (1, Td)       matching tile of l2_linear.weight
    # out_ref:  (Bb, D)       attention_output block (middle dim squeezed)
    # attw_ref: (Bb, Np)      attention_weight block (middle dim squeezed)
    # s_acc:    (Bb, Np) f32  score accumulator across out-feature tiles
    j = pl.program_id(1)
    nj = pl.num_programs(1)
    Bb, Np, D = x_ref.shape
    Td = w1t_ref.shape[1]

    @pl.when(j == 0)
    def _():
        s_acc[...] = jnp.zeros_like(s_acc)

    x = x_ref[...]                                   # (Bb, Np, D)
    xf = x.reshape(Bb * Np, D)                       # free relayout (Np % 8 == 0)
    w1t = w1t_ref[...]                               # (D, Td)
    if gemm_dtype is not None:
        a, b = xf.astype(gemm_dtype), w1t.astype(gemm_dtype)
    else:
        a, b = xf, w1t

    # ---- l1 tile = tanh(x @ W1^T[:, tile]) : native (M,K)x(K,N) MXU matmul.
    l1 = jnp.tanh(jnp.dot(a, b, preferred_element_type=jnp.float32))  # (Bb*Np, Td) f32

    # ---- partial scores: elementwise multiply by W2 tile + lane reduce (VPU/XLU).
    w2 = w2_ref[...].astype(jnp.float32)             # (1, Td)
    prod = (l1 * w2).reshape(Bb, Np, Td)             # (Bb, Np, Td)
    s_acc[...] += jnp.sum(prod, axis=-1)             # (Bb, Np) lane-dense f32

    @pl.when(j == nj - 1)
    def _():
        s = s_acc[...]                               # (Bb, Np)
        if Np != n_real:                             # static: mask padded chunks
            col = lax.broadcasted_iota(jnp.int32, (Bb, Np), 1)
            s = jnp.where(col < n_real, s, -jnp.inf)

        # ---- softmax over the chunk axis (2-D, lane-dense).
        m = jnp.max(s, axis=-1, keepdims=True)       # (Bb, 1)
        e = jnp.exp(s - m)                           # (Bb, Np); exp(-inf)=0 on pads
        attw = e / jnp.sum(e, axis=-1, keepdims=True)

        attw_ref[...] = attw.astype(attw_ref.dtype)

        # ---- attention_output = sum_n attw[b,n] * x[b,n,:]  (VPU mul + reduce;
        # avoids an M=1 MXU matmul).
        out = jnp.sum(attw[:, :, None] * x.astype(jnp.float32), axis=1)  # (Bb, D)
        out_ref[...] = out.astype(out_ref.dtype)


def chunk_attention_layer(x, w1, w2, *, block_b=128, block_d=512, gemm_dtype=None):
    """x: (B, N, D); w1: (D, D) torch layout (out,in); w2: (1, D).

    Returns (attention_output (B,1,D), attention_weight (B,1,N)).
    gemm_dtype=jnp.bfloat16 casts only the MXU GEMM inputs (accumulation stays f32).
    """
    B, N, D = x.shape
    assert w1.shape == (D, D) and w2.shape == (1, D)
    itemsize = jnp.dtype(x.dtype).itemsize

    # Pad the chunk axis to the f32 sublane tile so the in-kernel reshape is free.
    Np = _round_up(N, 8)

    # Out-feature tiling of W1 (second grid axis). Tile must be full or %128.
    block_d = _round_up(block_d, 128)
    if D <= block_d:
        Td, Dp = D, D
    else:
        Td = block_d
        Dp = _round_up(D, Td)

    # Pre-transpose W1 once (HBM side) -> native MXU orientation. Pad out-features
    # with zeros: tanh(x@0)=0 and w2 pad is 0, so padded tiles contribute nothing.
    w1t = jnp.transpose(w1)                          # (D_in, D_out)
    if Dp != D:
        w1t = jnp.pad(w1t, ((0, 0), (0, Dp - D)))
        w2p = jnp.pad(w2, ((0, 0), (0, Dp - D)))
    else:
        w2p = w2

    # Batch block: multiple of 8 sublanes, >=2 grid steps when possible (v7x
    # megacore), and capped so the x block (double-buffered) stays modest.
    max_xblock_bytes = 8 << 20
    bb_cap = max(8, (max_xblock_bytes // max(Np * D * itemsize, 1)) // 8 * 8)
    Bb = min(block_b, bb_cap, _round_up(pl.cdiv(B, 2), 8))
    Bb = max(8, (Bb // 8) * 8)
    B_pad = _round_up(B, Bb)

    if B_pad != B or Np != N:
        x_in = jnp.pad(x, ((0, B_pad - B), (0, Np - N), (0, 0)))
    else:
        x_in = x

    nb, nd = B_pad // Bb, Dp // Td

    # Dtype-aware advisory cost for XLA's scheduler.
    cost = pl.CostEstimate(
        flops=2 * B_pad * Np * D * Dp + 6 * B_pad * Np * D,
        transcendentals=B_pad * Np * Dp + B_pad * Np,
        bytes_accessed=(B_pad * Np * D * itemsize
                        + D * Dp * itemsize * (nb if nd > 1 else 1)
                        + Dp * itemsize
                        + B_pad * (D + Np) * itemsize),
    )

    # Explicit scoped-VMEM budget (default is 16 MiB on v5e / 32 MiB elsewhere).
    xblk = Bb * Np * D * itemsize
    w1blk = D * Td * itemsize
    interm = 3 * Bb * Np * max(Td, 128) * 4 + Bb * Np * D * 4
    outblk = Bb * D * itemsize + Bb * Np * itemsize
    working = 2 * xblk + 2 * w1blk + interm + 2 * outblk + Bb * Np * 4
    vmem_limit = int(min(max(working * 3 // 2 + (4 << 20), 32 << 20), 48 << 20))

    kernel = functools.partial(_chunk_attention_kernel,
                               n_real=N, gemm_dtype=gemm_dtype)

    out2d, attw2d = pl.pallas_call(
        kernel,
        out_shape=(
            jax.ShapeDtypeStruct((B_pad, D), x.dtype),    # attention_output (squeezed)
            jax.ShapeDtypeStruct((B_pad, Np), x.dtype),   # attention_weight (squeezed)
        ),
        grid_spec=pltpu.PrefetchScalarGridSpec(
            num_scalar_prefetch=0,
            grid=(nb, nd),                                # (batch blocks, W1 out-feature tiles)
            in_specs=[
                pl.BlockSpec((Bb, Np, D), lambda i, j: (i, 0, 0)),  # x (full D in-features)
                pl.BlockSpec((D, Td), lambda i, j: (0, j)),         # W1^T tile
                pl.BlockSpec((1, Td), lambda i, j: (0, j)),         # W2 tile
            ],
            out_specs=[
                pl.BlockSpec((Bb, D), lambda i, j: (i, 0)),         # attention_output
                pl.BlockSpec((Bb, Np), lambda i, j: (i, 0)),        # attention_weight
            ],
            scratch_shapes=[pltpu.VMEM((Bb, Np), jnp.float32)],     # score accumulator
        ),
        compiler_params=pltpu.CompilerParams(
            dimension_semantics=("parallel", "arbitrary"),
            vmem_limit_bytes=vmem_limit,
        ),
        cost_estimate=cost,
    )(x_in, w1t, w2p)

    attn_out = out2d[:B].reshape(B, 1, D)
    attn_w = attw2d[:B, :N].reshape(B, 1, N)
    return attn_out, attn_w


def reference(x, w1, w2):
    """Pure-JAX reference matching the PyTorch forward exactly."""
    l1 = jnp.tanh(jnp.einsum("bnd,ed->bne", x, w1))          # (B, N, D)
    s = jnp.einsum("bnd,od->bno", l1, w2)                     # (B, N, 1)
    a = jax.nn.softmax(s, axis=1)                             # softmax over dim=1
    aw = jnp.swapaxes(a, 1, 2)                                # (B, 1, N)
    out = jnp.matmul(aw, x)                                   # (B, 1, D)
    return out, aw


if __name__ == "__main__":
    # Small shapes consistent with the module: batch=2, num_chunks(seq)=8, d_model=32
    B, N, D = 2, 8, 32
    key = jax.random.PRNGKey(0)
    kx, kw1, kw2 = jax.random.split(key, 3)

    x = jax.random.normal(kx, (B, N, D), dtype=jnp.float32)

    # Deterministic parameter init matching torch.nn.init.normal_(mean, std)
    # with config.linear_init_mean=0.0, config.linear_init_std=0.03
    linear_init_mean, linear_init_std = 0.0, 0.03
    w1 = linear_init_mean + linear_init_std * jax.random.normal(
        kw1, (D, D), dtype=jnp.float32)          # l1_linear.weight (out, in)
    w2 = linear_init_mean + linear_init_std * jax.random.normal(
        kw2, (1, D), dtype=jnp.float32)          # l2_linear.weight

    attn_out, attn_w = chunk_attention_layer(x, w1, w2)
    attn_out = jax.block_until_ready(attn_out)
    attn_w = jax.block_until_ready(attn_w)

    ref_out, ref_w = reference(x, w1, w2)
    assert attn_out.shape == (B, 1, D)
    assert attn_w.shape == (B, 1, N)
    assert jnp.allclose(attn_out, ref_out, atol=1e-5, rtol=1e-5)
    assert jnp.allclose(attn_w, ref_w, atol=1e-5, rtol=1e-5)

    # Padded batch + padded chunk axis (N not a multiple of 8) + multi-step batch grid.
    B2, N2 = 10, 5
    x2 = jax.random.normal(jax.random.PRNGKey(1), (B2, N2, D), dtype=jnp.float32)
    o2, a2 = chunk_attention_layer(x2, w1, w2, block_b=8)
    o2 = jax.block_until_ready(o2)
    a2 = jax.block_until_ready(a2)
    r2o, r2w = reference(x2, w1, w2)
    assert jnp.allclose(o2, r2o, atol=1e-5, rtol=1e-5)
    assert jnp.allclose(a2, r2w, atol=1e-5, rtol=1e-5)

    # Out-feature (D) split path: second grid axis > 1, accumulate + pl.when finalize.
    B3, N3, D3 = 4, 8, 256
    k3x, k3w1, k3w2 = jax.random.split(jax.random.PRNGKey(2), 3)
    x3 = jax.random.normal(k3x, (B3, N3, D3), dtype=jnp.float32)
    w1_3 = linear_init_std * jax.random.normal(k3w1, (D3, D3), dtype=jnp.float32)
    w2_3 = linear_init_std * jax.random.normal(k3w2, (1, D3), dtype=jnp.float32)
    o3, a3 = chunk_attention_layer(x3, w1_3, w2_3, block_d=128)
    o3 = jax.block_until_ready(o3)
    a3 = jax.block_until_ready(a3)
    r3o, r3w = reference(x3, w1_3, w2_3)
    # Slightly looser: covers MXU f32 multi-pass emulation / reduction-order
    # differences between the in-kernel dot and XLA's einsum at larger D.
    assert jnp.allclose(o3, r3o, atol=2e-3, rtol=2e-3)
    assert jnp.allclose(a3, r3w, atol=2e-3, rtol=2e-3)

    # Opt-in bf16 MXU path (f32 accumulation / softmax); looser tolerance.
    ob, ab = chunk_attention_layer(x, w1, w2, gemm_dtype=jnp.bfloat16)
    ob = jax.block_until_ready(ob)
    ab = jax.block_until_ready(ab)
    assert jnp.allclose(ob, ref_out, atol=5e-3, rtol=5e-3)
    assert jnp.allclose(ab, ref_w, atol=5e-3, rtol=5e-3)

    print("KERNEL_OK")
</pallas_src>

<mosaic_0001>
module attributes {stable_mosaic.version = 11 : i64} {
  func.func @_chunk_attention_kernel(%arg0: i32, %arg1: i32, %arg2: memref<8x8x32xf32, #tpu.memory_space<vmem>>, %arg3: memref<32x32xf32, #tpu.memory_space<vmem>>, %arg4: memref<1x32xf32, #tpu.memory_space<vmem>>, %arg5: memref<8x32xf32, #tpu.memory_space<vmem>>, %arg6: memref<8x8xf32, #tpu.memory_space<vmem>>, %arg7: memref<8x8xf32, #tpu.memory_space<vmem>>) attributes {dimension_semantics = [#tpu.dimension_semantics<parallel>, #tpu.dimension_semantics<arbitrary>], iteration_bounds = array<i64: 1, 1>, scalar_prefetch = 0 : i64, scratch_operands = 1 : i64, tpu.core_type = #tpu.core_type<tc>, window_params = [{transform_indices = @transform_0, window_bounds = array<i64: 8, 8, 32>}, {transform_indices = @transform_1, window_bounds = array<i64: 32, 32>}, {transform_indices = @transform_2, window_bounds = array<i64: 1, 32>}, {transform_indices = @transform_3, window_bounds = array<i64: 8, 32>}, {transform_indices = @transform_4, window_bounds = array<i64: 8, 8>}]} {
    %c0_i32 = arith.constant 0 : i32
    %0 = arith.cmpi eq, %arg1, %c0_i32 : i32
    %1 = arith.extui %0 : i1 to i32
    %c0_i32_0 = arith.constant 0 : i32
    %2 = arith.cmpi ne, %1, %c0_i32_0 : i32
    scf.if %2 {
      %cst_14 = arith.constant 0.000000e+00 : f32
      %19 = vector.broadcast %cst_14 : f32 to vector<8x8xf32>
      %c0_15 = arith.constant 0 : index
      %c0_16 = arith.constant 0 : index
      %20 = vector.load %arg7[%c0_15, %c0_16] : memref<8x8xf32, #tpu.memory_space<vmem>>, vector<8x8xf32>
      tpu.vector_store %arg7[%c0_15, %c0_16], %19 {strides = array<i32>} : memref<8x8xf32, #tpu.memory_space<vmem>>, vector<8x8xf32>,
    } else {
    }
    %c0 = arith.constant 0 : index
    %c0_1 = arith.constant 0 : index
    %c0_2 = arith.constant 0 : index
    %3 = vector.load %arg2[%c0, %c0_1, %c0_2] : memref<8x8x32xf32, #tpu.memory_space<vmem>>, vector<8x8x32xf32>
    %4 = vector.shape_cast %3 : vector<8x8x32xf32> to vector<64x32xf32>
    %c0_3 = arith.constant 0 : index
    %c0_4 = arith.constant 0 : index
    %5 = vector.load %arg3[%c0_3, %c0_4] : memref<32x32xf32, #tpu.memory_space<vmem>>, vector<32x32xf32>
    %cst = arith.constant dense<0.000000e+00> : vector<64x32xf32>
    %6 = tpu.matmul %4, %5, %cst {dimension_numbers = #tpu.dot_dimension_numbers<[1], [0], [0], [1], [0, 0, 1, 1], [], []>} : vector<64x32xf32>, vector<32x32xf32>, vector<64x32xf32> -> vector<64x32xf32>
    %7 = math.tanh %6 : vector<64x32xf32>
    %c0_5 = arith.constant 0 : index
    %c0_6 = arith.constant 0 : index
    %8 = vector.load %arg4[%c0_5, %c0_6] : memref<1x32xf32, #tpu.memory_space<vmem>>, vector<1x32xf32>
    %9 = vector.broadcast %8 : vector<1x32xf32> to vector<64x32xf32>
    %10 = arith.mulf %7, %9 : vector<64x32xf32>
    %11 = vector.shape_cast %10 : vector<64x32xf32> to vector<8x8x32xf32>
    %c0_7 = arith.constant 0 : index
    %c0_8 = arith.constant 0 : index
    %12 = vector.load %arg7[%c0_7, %c0_8] : memref<8x8xf32, #tpu.memory_space<vmem>>, vector<8x8xf32>
    %cst_9 = arith.constant dense<0.000000e+00> : vector<8x8xf32>
    %13 = vector.multi_reduction <add>, %11, %cst_9 [2] : vector<8x8x32xf32> to vector<8x8xf32>
    %14 = arith.addf %12, %13 : vector<8x8xf32>
    %c0_10 = arith.constant 0 : index
    %c0_11 = arith.constant 0 : index
    %15 = vector.load %arg7[%c0_10, %c0_11] : memref<8x8xf32, #tpu.memory_space<vmem>>, vector<8x8xf32>
    tpu.vector_store %arg7[%c0_10, %c0_11], %14 {strides = array<i32>} : memref<8x8xf32, #tpu.memory_space<vmem>>, vector<8x8xf32>,
    %c0_i32_12 = arith.constant 0 : i32
    %16 = arith.cmpi eq, %arg1, %c0_i32_12 : i32
    %17 = arith.extui %16 : i1 to i32
    %c0_i32_13 = arith.constant 0 : i32
    %18 = arith.cmpi ne, %17, %c0_i32_13 : i32
    scf.if %18 {
      %c0_14 = arith.constant 0 : index
      %c0_15 = arith.constant 0 : index
      %19 = vector.load %arg7[%c0_14, %c0_15] : memref<8x8xf32, #tpu.memory_space<vmem>>, vector<8x8xf32>
      %cst_16 = arith.constant dense<0xFF800000> : vector<8xf32>
      %20 = vector.multi_reduction <maximumf>, %19, %cst_16 [1] : vector<8x8xf32> to vector<8xf32>
      %21 = vector.shape_cast %20 : vector<8xf32> to vector<8x1xf32>
      %22 = vector.broadcast %21 : vector<8x1xf32> to vector<8x8xf32>
      %23 = arith.subf %19, %22 : vector<8x8xf32>
      %24 = math.exp %23 : vector<8x8xf32>
      %cst_17 = arith.constant dense<0.000000e+00> : vector<8xf32>
      %25 = vector.multi_reduction <add>, %24, %cst_17 [1] : vector<8x8xf32> to vector<8xf32>
      %26 = vector.shape_cast %25 : vector<8xf32> to vector<8x1xf32>
      %27 = vector.broadcast %26 : vector<8x1xf32> to vector<8x8xf32>
      %28 = arith.divf %24, %27 : vector<8x8xf32>
      %c0_18 = arith.constant 0 : index
      %c0_19 = arith.constant 0 : index
      %29 = vector.load %arg6[%c0_18, %c0_19] : memref<8x8xf32, #tpu.memory_space<vmem>>, vector<8x8xf32>
      tpu.vector_store %arg6[%c0_18, %c0_19], %28 {strides = array<i32>} : memref<8x8xf32, #tpu.memory_space<vmem>>, vector<8x8xf32>,
      %30 = vector.shape_cast %28 : vector<8x8xf32> to vector<8x8x1xf32>
      %31 = vector.broadcast %30 : vector<8x8x1xf32> to vector<8x8x32xf32>
      %32 = arith.mulf %31, %3 : vector<8x8x32xf32>
      %cst_20 = arith.constant dense<0.000000e+00> : vector<8x32xf32>
      %33 = vector.multi_reduction <add>, %32, %cst_20 [1] : vector<8x8x32xf32> to vector<8x32xf32>
      %c0_21 = arith.constant 0 : index
      %c0_22 = arith.constant 0 : index
      %34 = vector.load %arg5[%c0_21, %c0_22] : memref<8x32xf32, #tpu.memory_space<vmem>>, vector<8x32xf32>
      tpu.vector_store %arg5[%c0_21, %c0_22], %33 {strides = array<i32>} : memref<8x32xf32, #tpu.memory_space<vmem>>, vector<8x32xf32>,
    } else {
    }
    return
  }
  func.func @transform_0(%arg0: i32, %arg1: i32) -> (i32, i32, i32) {
    %c0_i32 = arith.constant 0 : i32
    %c0_i32_0 = arith.constant 0 : i32
    %c0_i32_1 = arith.constant 0 : i32
    return %arg0, %c0_i32, %c0_i32_0 : i32, i32, i32
  }
  func.func @transform_1(%arg0: i32, %arg1: i32) -> (i32, i32) {
    %c0_i32 = arith.constant 0 : i32
    %c0_i32_0 = arith.constant 0 : i32
    return %c0_i32, %arg1 : i32, i32
  }
  func.func @transform_2(%arg0: i32, %arg1: i32) -> (i32, i32) {
    %c0_i32 = arith.constant 0 : i32
    %c0_i32_0 = arith.constant 0 : i32
    return %c0_i32, %arg1 : i32, i32
  }
  func.func @transform_3(%arg0: i32, %arg1: i32) -> (i32, i32) {
    %c0_i32 = arith.constant 0 : i32
    %c0_i32_0 = arith.constant 0 : i32
    return %arg0, %c0_i32 : i32, i32
  }
  func.func @transform_4(%arg0: i32, %arg1: i32) -> (i32, i32) {
    %c0_i32 = arith.constant 0 : i32
    %c0_i32_0 = arith.constant 0 : i32
    return %arg0, %c0_i32 : i32, i32
  }
}

</mosaic_0001>

<bundles_post_ra>
// kernel: tpu_custom_call.1
= control target key start
LH: loop header
LB: loop body
LE: loop exit
PB: predicated region body
PF: predicated region fallthrough
CT: control target
= control target key end

     0   :  { %10 = vsyncpa [#allocation4], 0  ;;  %s831_s0 = inlined_call_operand.hbm [shape: f32[8,8,32], index: 0, kind: input, shape index: {}]   ;;  %s832_s1 = inlined_call_operand.hbm [shape: f32[32,32], index: 1, kind: input, shape index: {}]   ;;  %s833_s2 = inlined_call_operand.vmem [shape: f32[1,32], index: 2, kind: input, shape index: {}]   ;;  %s834_s3 = inlined_call_operand.hbm [shape: f32[8,32], index: 3, kind: output, shape index: {0}]   ;;  %s835_s4 = inlined_call_operand.hbm [shape: f32[8,8], index: 4, kind: output, shape index: {1}]  }
   0x1   :  { %11 = vsyncpa [#allocation7], 0 }
   0x2   :  { %12 = vsyncpa [#allocation5], 0 }
   0x3   :  { %13 = vsyncpa [#allocation10], 0  ;;  %s661_s15 = smov [#allocation3]   ;;  %s565_s19 = scalar_lea.hbm %s831_s0, 1024 }
   0x4   :  { %s19_s16 = sshll.u32 %s661_s15, 4  ;;  %p566_p0 = scmp.ne.s32.totalorder %s831_s0, %s565_s19  ;;  %s20_s16 = int_to_ptr.vmem [resolvable:$true] %s19_s16 }
   0x5   :  { %p569_p1 = scmp.lt.u32.totalorder %s565_s19, %s831_s0 }
   0x7   :  { %p571_p2 = pnand %p569_p1, %p566_p0 }
   0x9   :  { %574 = shalt.err (!%p571_p2)
}
   0xa   :  { %s575_s24 = scalar_lea.vmem %s20_s16, 1024  ;;  %p580_p4 = scmp.lt.s32.totalorder %s20_s16, %s20_s16 }
   0xb   :  { %p576_p3 = scmp.ne.s32.totalorder %s20_s16, %s575_s24  ;;  %p581_p5 = scmp.lt.s32.totalorder %s575_s24, %s575_s24 }
   0xd   :  { %p582_p6 = por %p581_p5, %p580_p4 }
   0xf   :  { %p583_p7 = pnand %p582_p6, %p576_p3 }
  0x11   :  { %586 = shalt.err (!%p583_p7)
}
  0x12   :  { %s662_s25 = smov 128   ;;  %s663_s26 = smov 8  }
  0x13   :  { %25 = dma.hbm_to_vmem [thread:$0]  %s831_s0, 1024, %s20_s16, [#allocation4], %s662_s25, %s662_s25, %s663_s26  }
  0x14   :  { %s664_s29 = smov [#allocation6]   ;;  %s587_s7 = scalar_lea.hbm %s832_s1, 512 }
  0x15   :  { %s31_s30 = sshll.u32 %s664_s29, 4  ;;  %p588_p8 = scmp.ne.s32.totalorder %s832_s1, %s587_s7  ;;  %s32_s30 = int_to_ptr.vmem [resolvable:$true] %s31_s30 }
  0x16   :  { %p591_p9 = scmp.lt.u32.totalorder %s587_s7, %s832_s1 }
  0x18   :  { %p593_p10 = pnand %p591_p9, %p588_p8 }
  0x1a   :  { %596 = shalt.err (!%p593_p10)
}
  0x1b   :  { %s597_s12 = scalar_lea.vmem %s32_s30, 512  ;;  %p602_p12 = scmp.lt.s32.totalorder %s32_s30, %s32_s30 }
  0x1c   :  { %p598_p11 = scmp.ne.s32.totalorder %s32_s30, %s597_s12  ;;  %p603_p13 = scmp.lt.s32.totalorder %s597_s12, %s597_s12 }
  0x1e   :  { %p604_p0 = por %p603_p13, %p602_p12 }
  0x20   :  { %p605_p1 = pnand %p604_p0, %p598_p11 }
  0x22   :  { %608 = shalt.err (!%p605_p1)
}
  0x23   :  { %37 = dma.hbm_to_vmem [thread:$0]  %s832_s1, 512, %s32_s30, [#allocation7], %s662_s25, %s662_s25, %s663_s26  }
  0x24   :  { %653 = dma.done.wait [#allocation4], 1024  }
  0x25   :  { %654 = vsyncadd [#allocation4], 4294966272 }
  0x26   :  { %655 = dma.done.wait [#allocation7], 512  }
  0x27   :  { %656 = vsyncadd [#allocation7], 4294966784  ;;  %vm64_vm0 = vcmask 261120   ;;  %v60_v0 = vld [vmem:[#allocation6] sm:$0xff]  ;;  %v61_v1 = vld [vmem:[#allocation6 + $0x8] sm:$0xff]  ;;  %vm50_vm1 = vcmask 64512   ;;  %v250_v48 = vlaneseq }
  0x28   :  { %v62_v2 = vld [vmem:[#allocation6 + $0x10] sm:$0xff]  ;;  %v526_v3 = vpack.c.bf16 %v61_v1, %v60_v0  ;;  %v63_v4 = vld [vmem:[#allocation6 + $0x18] sm:$0xff]  ;;  %v717_v5 = vld [vmem:[#allocation3] sm:$0xff]  ;;  %v665_v47 = vmov 0.0   ;;  %vm284_vm2 = vcmask 1041409   ;;  %vm286_vm3 = vcmask 1042434  }
  0x29   :  { %v530_v6 = vpack.c.bf16 %v63_v4, %v62_v2  ;;  %514 = vmatprep.mubr.msk.f32.mxu0 %vm64_vm0, %v717_v5  ;;  %v721_v7 = vld [vmem:[#allocation3 + $0x20] sm:$0xff]  ;;  %v725_v8 = vld [vmem:[#allocation3 + $0x8] sm:$0xff]  ;;  %v729_v10 = vld [vmem:[#allocation3 + $0x10] sm:$0xff]  ;;  %51 = vst.msk [vmem:[#allocation2] sm:$0xff] %vm50_vm1, %v665_v47  ;;  %v251_v49 = vand.u32 127, %v250_v48  ;;  %v761_v50 = vshrl.u32 %v250_v48, 7 }
  0x2a   :  { %527 = vmatprep.subr.bf16.mxu0 %v526_v3  ;;  %534 = vmatprep.subr.bf16.mxu1 %v526_v3  ;;  %v727_v9 = vld [vmem:[#allocation3 + $0x28] sm:$0xff]  ;;  %v731_v11 = vld [vmem:[#allocation3 + $0x30] sm:$0xff]  ;;  %v739_v12 = vld [vmem:[#allocation3 + $0x18] sm:$0xff]  ;;  %vm288_vm4 = vcmask 1043459   ;;  %vm290_vm5 = vcmask 1044484   ;;  %vm292_vm6 = vcmask 1045509  }
  0x2b   :  { %529 = vmatpush3.bf16.msra.mxu0 %v526_v3  ;;  %536 = vmatpush3.bf16.msra.mxu1 %v526_v3  ;;  %v743_v13 = vld [vmem:[#allocation3 + $0x38] sm:$0xff]  ;;  %v254_v52 = vsub.s32 %v251_v49, %v761_v50  ;;  %vm294_vm7 = vcmask 1046534   ;;  %vm296_vm8 = vcmask 1047559  }
  0x2c   :  { %531 = vmatprep.subr.bf16.mxu0 %v530_v6  ;;  %535 = vmatprep.subr.bf16.mxu1 %v530_v6  ;;  %v493_v22 = vld [vmem:[%s833_s2] ss:$0 sm:$0xff]  ;;  %s666_s2 = smov [#allocation9]  }
  0x2d   :  { %520 = vmatprep.mubr.msk.f32.mxu1 %vm64_vm0, %v721_v7  ;;  %s471_s15 = sshll.u32 %s666_s2, 4  ;;  %s472_s15 = int_to_ptr.vmem [resolvable:$true] %s471_s15 }
  0x2e   :  { %s609_s16 = scalar_lea.vmem %s472_s15, 128  ;;  %p614_p3 = scmp.lt.s32.totalorder %s472_s15, %s472_s15 }
  0x2f   :  { %533 = vmatpush3.bf16.msra.mxu0 %v530_v6  ;;  %537 = vmatpush3.bf16.msra.mxu1 %v530_v6  ;;  %p610_p2 = scmp.ne.s32.totalorder %s472_s15, %s609_s16  ;;  %p615_p4 = scmp.lt.s32.totalorder %s609_s16, %s609_s16 }
  0x31   :  { %p616_p5 = por %p615_p4, %p614_p3 }
  0x32   :  { %515 = vmatmul.mubr.msk.f32.vlgmr.msra.gmra.mrb[0].mxu0 %vm64_vm0, %v725_v8  ;;  %521 = vmatmul.mubr.msk.f32.vlgmr.msra.gmra.mrb[0].mxu1 %vm64_vm0, %v727_v9 }
  0x33   :  { %517 = vmatprep.mubr.msk.f32.mxu0 %vm64_vm0, %v729_v10  ;;  %523 = vmatprep.mubr.msk.f32.mxu1 %vm64_vm0, %v731_v11  ;;  %p617_p6 = pnand %p616_p5, %p610_p2 }
  0x36   :  { %518 = vmatmul.mubr.msk.f32.gmra.mrb[2].mxu0 %vm64_vm0, %v739_v12  ;;  %524 = vmatmul.mubr.msk.f32.gmra.mrb[2].mxu1 %vm64_vm0, %v743_v13 }
 0x105   :  { %v516_v14 = vpop.f32.mrb[0].mxu0  ;;  %v522_v15 = vpop.f32.mrb[0].mxu1 }
 0x106   :  { %545 = vtanh.f32 %v516_v14  ;;  %v155_v16 = vpop.f32.mrb[1].mxu0  ;;  %v175_v17 = vpop.f32.mrb[1].mxu1 }
 0x107   :  { %547 = vtanh.f32 %v155_v16  ;;  %v217_v16 = vld [vmem:[#allocation2] sm:$0xff] }
 0x108   :  { %549 = vtanh.f32 %v175_v17 }
 0x109   :  { %v519_v18 = vpop.f32.mrb[2].mxu0  ;;  %v525_v19 = vpop.f32.mrb[2].mxu1 }
 0x10a   :  { %551 = vtanh.f32 %v519_v18  ;;  %v165_v20 = vpop.f32.mrb[3].mxu0  ;;  %v185_v21 = vpop.f32.mrb[3].mxu1 }
 0x10b   :  { %553 = vtanh.f32 %v165_v20 }
 0x10c   :  { %555 = vtanh.f32 %v185_v21 }
 0x10d   :  { %557 = vtanh.f32 %v522_v15 }
 0x10e   :  { %559 = vtanh.f32 %v525_v19 }
 0x110   :  { %v546_v23 = vpop.eup %545 }
 0x111   :  { %v548_v24 = vpop.eup %547  ;;  %v210_v25 = vmul.f32 %v546_v23, %v493_v22 }
 0x112   :  { %v550_v26 = vpop.eup %549  ;;  %v209_v28 = vmul.f32 %v548_v24, %v493_v22 }
 0x113   :  { %v221_v27 = vsel %vm64_vm0, %v210_v25, 0.0  ;;  %v213_v32 = vmul.f32 %v550_v26, %v493_v22 }
 0x114   :  { %v552_v29 = vpop.eup %551  ;;  %222 = vadd.xlane.f32.xlu0 %v221_v27  ;;  %v218_v34 = vsel %vm64_vm0, %v209_v28, 0.0 }
 0x115   :  { %v554_v30 = vpop.eup %553  ;;  %v212_v31 = vmul.f32 %v552_v29, %v493_v22  ;;  %v230_v38 = vsel %vm64_vm0, %v213_v32, 0.0  ;;  %v327_v29 = vsub.s32 1, %v761_v50 }
 0x116   :  { %v556_v33 = vpop.eup %555  ;;  %v211_v36 = vmul.f32 %v554_v30, %v493_v22  ;;  %v320_v30 = vsub.s32 0, %v761_v50 }
 0x117   :  { %v227_v35 = vsel %vm64_vm0, %v212_v31, 0.0  ;;  %v558_v37 = vpop.eup %557  ;;  %v215_v39 = vmul.f32 %v556_v33, %v493_v22 }
 0x118   :  { %219 = vadd.xlane.f32.xlu0 %v218_v34  ;;  %228 = vadd.xlane.f32.xlu1 %v227_v35  ;;  %v224_v40 = vsel %vm64_vm0, %v211_v36, 0.0  ;;  %v214_v41 = vmul.f32 %v558_v37, %v493_v22  ;;  %v560_v42 = vpop.eup %559  ;;  %v334_v35 = vsub.s32 2, %v761_v50  ;;  %v348_v36 = vsub.s32 4, %v761_v50 }
 0x119   :  { %v236_v43 = vsel %vm64_vm0, %v215_v39, 0.0  ;;  %v216_v45 = vmul.f32 %v560_v42, %v493_v22  ;;  %v341_v39 = vsub.s32 3, %v761_v50 }
 0x11a   :  { %v233_v44 = vsel %vm64_vm0, %v214_v41, 0.0 }
 0x11b   :  { %v239_v46 = vsel %vm64_vm0, %v216_v45, 0.0  ;;  %v369_v45 = vsub.s32 7, %v761_v50 }
 0x11c   :  { %225 = vadd.xlane.f32.xlu1 %v224_v40  ;;  %231 = vadd.xlane.f32.xlu0 %v230_v38  ;;  %v362_v40 = vsub.s32 6, %v761_v50 }
 0x120   :  { %234 = vadd.xlane.f32.xlu1 %v233_v44  ;;  %237 = vadd.xlane.f32.xlu0 %v236_v43  ;;  %v355_v43 = vsub.s32 5, %v761_v50 }
 0x124   :  { %240 = vadd.xlane.f32.xlu1 %v239_v46 }
 0x1a1   :  { %v223_v51 = vpop.xlane.xlu0 %222 }
 0x1a2   :  { %v259_v56 = vrot.slane %v223_v51, %v254_v52 }
 0x1a5   :  { %v220_v53 = vpop.xlane.xlu0 %219  ;;  %v229_v54 = vpop.xlane.xlu1 %228 }
 0x1a6   :  { %v255_v55 = vrot.slane %v220_v53, %v254_v52  ;;  %v267_v62 = vrot.slane %v229_v54, %v254_v52 }
 0x1a8   :  { %v285_v61 = vsel %vm284_vm2, %v259_v56, %v255_v55 }
 0x1a9   :  { %v226_v57 = vpop.xlane.xlu1 %225  ;;  %v232_v58 = vpop.xlane.xlu0 %231 }
 0x1aa   :  { %v263_v59 = vrot.slane %v226_v57, %v254_v52  ;;  %v271_v60 = vrot.slane %v232_v58, %v254_v52 }
 0x1ac   :  { %v287_v63 = vsel %vm286_vm3, %v263_v59, %v285_v61 }
 0x1ad   :  { %v289_v0 = vsel %vm288_vm4, %v267_v62, %v287_v63  ;;  %v235_v1 = vpop.xlane.xlu1 %234  ;;  %v238_v2 = vpop.xlane.xlu0 %237 }
 0x1ae   :  { %v291_v3 = vsel %vm290_vm5, %v271_v60, %v289_v0  ;;  %v275_v4 = vrot.slane %v235_v1, %v254_v52  ;;  %v279_v6 = vrot.slane %v238_v2, %v254_v52 }
 0x1b0   :  { %v293_v14 = vsel %vm292_vm6, %v275_v4, %v291_v3 }
 0x1b1   :  { %v241_v15 = vpop.xlane.xlu1 %240  ;;  %v295_v18 = vsel %vm294_vm7, %v279_v6, %v293_v14 }
 0x1b2   :  { %v283_v17 = vrot.slane %v241_v15, %v254_v52 }
 0x1b4   :  { %v297_v19 = vsel %vm296_vm8, %v283_v17, %v295_v18 }
 0x1b5   :  { %v299_v20 = vadd.f32 %v297_v19, %v217_v16 }
 0x1b7   :  { %301 = vst.msk [vmem:[#allocation2] sm:$0xff] %vm50_vm1, %v299_v20 }
 0x1be   :  { %v305_v21 = vld [vmem:[#allocation2] sm:$0xff] }
 0x1bf   :  { %v306_v22 = vsel %vm50_vm1, %v305_v21, -inf }
 0x1c0   :  { %307 = vmax.xlane.f32.xlu0 %v306_v22 }
 0x24d   :  { %v308_v23 = vpop.xlane.xlu0 %307 }
 0x24e   :  { %v309_v24 = vsub.f32 %v305_v21, %v308_v23 }
 0x250   :  { %v310_v25 = vmul.f32 1.442695, %v309_v24 }
 0x252   :  { %561 = vpow2.f32 %v310_v25 }
 0x25c   :  { %v562_v26 = vpop.eup %561 }
 0x25d   :  { %v312_v27 = vsel %vm50_vm1, %v562_v26, 0.0 }
 0x25e   :  { %313 = vadd.xlane.f32.xlu1 %v312_v27 }
 0x2eb   :  { %v314_v28 = vpop.xlane.xlu1 %313 }
 0x2ec   :  { %563 = vrcp.f32 %v314_v28 }
 0x2f6   :  { %v564_v31 = vpop.eup %563 }
 0x2f7   :  { %v316_v32 = vmul.f32 %v564_v31, %v562_v26 }
 0x2f9   :  { %317 = vst.msk [vmem:[#allocation9] sm:$0xff] %vm50_vm1, %v316_v32  ;;  %v328_v33 = vrot.slane %v316_v32, %v327_v29  ;;  %v321_v34 = vrot.slane %v316_v32, %v320_v30  ;;  %v335_v37 = vrot.slane %v316_v32, %v334_v35  ;;  %v349_v38 = vrot.slane %v316_v32, %v348_v36 }
 0x2fa   :  { %v342_v41 = vrot.slane %v316_v32, %v341_v39  ;;  %v363_v42 = vrot.slane %v316_v32, %v362_v40  ;;  %v356_v44 = vrot.slane %v316_v32, %v355_v43  ;;  %v370_v46 = vrot.slane %v316_v32, %v369_v45 }
 0x2fb   :  { %330 = vbcast.lane.b32.xlu1 %v328_v33, 256  ;;  %323 = vbcast.lane.b32.xlu0 %v321_v34, 256 }
 0x2ff   :  { %337 = vbcast.lane.b32.xlu1 %v335_v37, 256  ;;  %351 = vbcast.lane.b32.xlu0 %v349_v38, 256 }
 0x303   :  { %344 = vbcast.lane.b32.xlu1 %v342_v41, 256  ;;  %365 = vbcast.lane.b32.xlu0 %v363_v42, 256 }
 0x307   :  { %358 = vbcast.lane.b32.xlu1 %v356_v44, 256 }
 0x30b   :  { %372 = vbcast.lane.b32.xlu1 %v370_v46, 256 }
 0x30c   :  { %620 = shalt.err (!%p617_p6)
}
 0x30d   :  { %s621_s19 = scalar_lea.hbm %s835_s4, 128 }
 0x30e   :  { %p622_p7 = scmp.ne.s32.totalorder %s835_s4, %s621_s19  ;;  %p625_p8 = scmp.lt.u32.totalorder %s621_s19, %s835_s4 }
 0x310   :  { %p627_p9 = pnand %p625_p8, %p622_p7 }
 0x312   :  { %630 = shalt.err (!%p627_p9)
}
 0x313   :  { %474 = dma.vmem_to_hbm [thread:$0]  %s472_s15, 128, %s835_s4, [#allocation10]  }
 0x314   :  { %s667_s4 = smov [#allocation8]  }
 0x315   :  { %s461_s26 = sshll.u32 %s667_s4, 4  ;;  %s462_s26 = int_to_ptr.vmem [resolvable:$true] %s461_s26 }
 0x316   :  { %s631_s27 = scalar_lea.vmem %s462_s26, 128  ;;  %p636_p11 = scmp.lt.s32.totalorder %s462_s26, %s462_s26 }
 0x317   :  { %p632_p10 = scmp.ne.s32.totalorder %s462_s26, %s631_s27  ;;  %p637_p12 = scmp.lt.s32.totalorder %s631_s27, %s631_s27 }
 0x319   :  { %p638_p13 = por %p637_p12, %p636_p11 }
 0x31b   :  { %p639_p0 = pnand %p638_p13, %p632_p10 }
 0x36d   :  { %v331_v47 = vpop.permute.xlu1 %330  ;;  %v324_v48 = vpop.permute.xlu0 %323 }
 0x36e   :  { %v375_v49 = vmul.f32 %v331_v47, %v725_v8  ;;  %v374_v50 = vmul.f32 %v324_v48, %v717_v5 }
 0x370   :  { %v389_v51 = vsel %vm64_vm0, %v375_v49, 0.0  ;;  %v382_v52 = vsel %vm64_vm0, %v374_v50, 0.0 }
 0x371   :  { %v390_v53 = vrot.slane %v389_v51, 4  ;;  %v383_v54 = vrot.slane %v382_v52, 4  ;;  %v338_v55 = vpop.permute.xlu1 %337  ;;  %v352_v56 = vpop.permute.xlu0 %351 }
 0x372   :  { %v376_v57 = vmul.f32 %v338_v55, %v729_v10  ;;  %v378_v58 = vmul.f32 %v352_v56, %v721_v7 }
 0x373   :  { %v391_v59 = vadd.f32 %v390_v53, %v389_v51  ;;  %v384_v60 = vadd.f32 %v383_v54, %v382_v52 }
 0x374   :  { %v396_v61 = vsel %vm64_vm0, %v376_v57, 0.0  ;;  %v410_v8 = vsel %vm64_vm0, %v378_v58, 0.0 }
 0x375   :  { %v392_v62 = vrot.slane %v391_v59, 2  ;;  %v385_v5 = vrot.slane %v384_v60, 2  ;;  %v397_v63 = vrot.slane %v396_v61, 4  ;;  %v411_v0 = vrot.slane %v410_v8, 4  ;;  %v345_v1 = vpop.permute.xlu1 %344  ;;  %v366_v2 = vpop.permute.xlu0 %365 }
 0x376   :  { %v377_v3 = vmul.f32 %v345_v1, %v739_v12  ;;  %v380_v4 = vmul.f32 %v366_v2, %v731_v11 }
 0x377   :  { %v393_v6 = vadd.f32 %v392_v62, %v391_v59  ;;  %v398_v10 = vadd.f32 %v397_v63, %v396_v61  ;;  %v412_v14 = vadd.f32 %v411_v0, %v410_v8  ;;  %v386_v7 = vadd.f32 %v385_v5, %v384_v60 }
 0x378   :  { %v403_v15 = vsel %vm64_vm0, %v377_v3, 0.0  ;;  %v424_v16 = vsel %vm64_vm0, %v380_v4, 0.0 }
 0x379   :  { %v399_v17 = vrot.slane %v398_v10, 2  ;;  %v359_v18 = vpop.permute.xlu1 %358  ;;  %v413_v19 = vrot.slane %v412_v14, 2  ;;  %v404_v20 = vrot.slane %v403_v15, 4  ;;  %v425_v21 = vrot.slane %v424_v16, 4 }
 0x37a   :  { %v379_v22 = vmul.f32 %v359_v18, %v727_v9  ;;  %v394_v23 = vrot.slane %v393_v6, 1  ;;  %v387_v12 = vrot.slane %v386_v7, 1 }
 0x37b   :  { %v400_v24 = vadd.f32 %v399_v17, %v398_v10  ;;  %v405_v25 = vadd.f32 %v404_v20, %v403_v15  ;;  %v426_v11 = vadd.f32 %v425_v21, %v424_v16  ;;  %v414_v30 = vadd.f32 %v413_v19, %v412_v14 }
 0x37c   :  { %v417_v26 = vsel %vm64_vm0, %v379_v22, 0.0  ;;  %v395_v35 = vadd.f32 %v394_v23, %v393_v6  ;;  %v388_v36 = vadd.f32 %v387_v12, %v386_v7 }
 0x37d   :  { %v401_v27 = vrot.slane %v400_v24, 1  ;;  %v418_v28 = vrot.slane %v417_v26, 4  ;;  %v373_v29 = vpop.permute.xlu1 %372  ;;  %v406_v31 = vrot.slane %v405_v25, 2  ;;  %v427_v32 = vrot.slane %v426_v11, 2 }
 0x37e   :  { %v381_v33 = vmul.f32 %v373_v29, %v743_v13  ;;  %v415_v41 = vrot.slane %v414_v30, 1  ;;  %v446_v46 = vsel %vm284_vm2, %v395_v35, %v388_v36 }
 0x37f   :  { %v419_v34 = vadd.f32 %v418_v28, %v417_v26  ;;  %v407_v37 = vadd.f32 %v406_v31, %v405_v25  ;;  %v402_v38 = vadd.f32 %v401_v27, %v400_v24  ;;  %v428_v43 = vadd.f32 %v427_v32, %v426_v11 }
 0x380   :  { %v431_v9 = vsel %vm64_vm0, %v381_v33, 0.0  ;;  %v416_v50 = vadd.f32 %v415_v41, %v414_v30 }
 0x381   :  { %v420_v39 = vrot.slane %v419_v34, 2  ;;  %v432_v40 = vrot.slane %v431_v9, 4  ;;  %v408_v42 = vrot.slane %v407_v37, 1  ;;  %v447_v48 = vsel %vm286_vm3, %v402_v38, %v446_v46 }
 0x382   :  { %v429_v52 = vrot.slane %v428_v43, 1 }
 0x383   :  { %v421_v44 = vadd.f32 %v420_v39, %v419_v34  ;;  %v433_v45 = vadd.f32 %v432_v40, %v431_v9  ;;  %v409_v47 = vadd.f32 %v408_v42, %v407_v37 }
 0x384   :  { %v430_v58 = vadd.f32 %v429_v52, %v428_v43 }
 0x385   :  { %v422_v13 = vrot.slane %v421_v44, 1  ;;  %v434_v49 = vrot.slane %v433_v45, 2  ;;  %v448_v51 = vsel %vm288_vm4, %v409_v47, %v447_v48 }
 0x386   :  { %v449_v55 = vsel %vm290_vm5, %v416_v50, %v448_v51 }
 0x387   :  { %v423_v53 = vadd.f32 %v422_v13, %v421_v44  ;;  %v435_v54 = vadd.f32 %v434_v49, %v433_v45 }
 0x389   :  { %v436_v56 = vrot.slane %v435_v54, 1  ;;  %v450_v57 = vsel %vm292_vm6, %v423_v53, %v449_v55 }
 0x38a   :  { %v451_v60 = vsel %vm294_vm7, %v430_v58, %v450_v57 }
 0x38b   :  { %v437_v59 = vadd.f32 %v436_v56, %v435_v54 }
 0x38d   :  { %v452_v61 = vsel %vm296_vm8, %v437_v59, %v451_v60 }
 0x38e   :  { %454 = vst.msk [vmem:[#allocation8] sm:$0xff] %vm64_vm0, %v452_v61 }
 0x38f   :  { %642 = shalt.err (!%p639_p0)
}
 0x390   :  { %s643_s30 = scalar_lea.hbm %s834_s3, 128 }
 0x391   :  { %p644_p1 = scmp.ne.s32.totalorder %s834_s3, %s643_s30  ;;  %p647_p2 = scmp.lt.u32.totalorder %s643_s30, %s834_s3 }
 0x393   :  { %p649_p3 = pnand %p647_p2, %p644_p1 }
 0x395   :  { %652 = shalt.err (!%p649_p3)
}
 0x396   :  { %464 = dma.vmem_to_hbm [thread:$0]  %s462_s26, 128, %s834_s3, [#allocation5]  }
 0x397   :  { %657 = dma.done.wait [#allocation5], 128  }
 0x398   :  { %658 = vsyncadd [#allocation5], 4294967168 }
 0x399   :  { %659 = dma.done.wait [#allocation10], 128  }
 0x39a   :  { %660 = vsyncadd [#allocation10], 4294967168 }
 0x39b   :  { %481 = vsyncpa [#allocation4], 1 }
 0x39c   :  { %482 = vsyncpa [#allocation7], 1 }
 0x39d   :  { %483 = vsyncpa [#allocation5], 1 }
 0x39e   :  { %484 = vsyncpa [#allocation10], 1 }

</bundles_post_ra>
